<compile_context>
chip_gen: v7x
topology: tpu7x:2x2x1
jax: 0.10.0
libtpu: 0.0.40
codegen_flags: <defaults>
</compile_context>

<pallas_src>
import math

import jax
import jax.numpy as jnp
from jax.experimental import pallas as pl
from jax.experimental.pallas import tpu as pltpu

_LANES = 128
_SUBLANES = 8


def _round_up(x, m):
    return ((x + m - 1) // m) * m


# ---------------------------------------------------------------------------
# Kernels
# ---------------------------------------------------------------------------
def _finish(t_lane, freq, phase, out_ref):
    # ang = t * freq + phase ; cos half is encoded as phase = pi/2.
    out_ref[...] = jnp.sin(t_lane * freq + phase).astype(out_ref.dtype)


def _packed_kernel(t_ref, w_ref, tab_ref, out_ref):
    # t_ref  : (TB, KP) f32 -- k packed timesteps per output row (zero padded)
    # w_ref  : (KP, W)  f32 -- 0/1 block one-hot: row j is 1 on lanes [j*dim,(j+1)*dim)
    # tab_ref: (2, W)   f32 -- row 0 freq, row 1 phase (0 | pi/2), tiled k times
    # out_ref: (TB, W)
    #
    # The broadcast of t[:, j] across its dim-wide lane group runs on the
    # otherwise-idle MXU.  f32 + HIGHEST precision is required: a bf16 pass on
    # t ~ 1e3 would destroy the angle entirely.  Since W is 0/1 the product is
    # exact under any >=3-pass / fp32 contraction.
    t_lane = jnp.dot(t_ref[...], w_ref[...],
                     preferred_element_type=jnp.float32,
                     precision=jax.lax.Precision.HIGHEST)
    _finish(t_lane, tab_ref[0:1, :], tab_ref[1:2, :], out_ref)


def _rowwise_kernel(t_ref, tab_ref, out_ref):
    # t_ref  : (TB, 1) f32 ; tab_ref: (2, W) f32 ; out_ref: (TB, W)
    # dim >= 128 (or padded-lane) path: no broadcast machinery needed at all.
    _finish(t_ref[...], tab_ref[0:1, :], tab_ref[1:2, :], out_ref)


# ---------------------------------------------------------------------------
# Wrapper
# ---------------------------------------------------------------------------
def _default_vmem_budget_bytes():
    # v5e/v6e: 128 MiB physical VMEM -> allow 32 MiB of output tiles.
    # v7x: 64 MiB physical (32 MiB scoped default) -> stay at 16 MiB.
    try:
        cap = pltpu.get_tpu_info().vmem_capacity_bytes
    except Exception:  # conservative fallback if the query is unavailable
        return 16 * 1024 * 1024
    return 32 * 1024 * 1024 if cap >= 96 * 1024 * 1024 else 16 * 1024 * 1024


def sinusoidal_position_embeddings(time, dim, *, out_dtype=jnp.float32,
                                   block_rows=8192, vmem_budget_bytes=None):
    """time: (B,) timesteps -> (B, dim) = concat(sin(t*f), cos(t*f), axis=-1).

    Fast path: pass out_dtype=jnp.bfloat16 when the downstream time-MLP is
    bf16 -- the (B, dim) writeback is the only significant HBM traffic.
    """
    if dim % 2 != 0 or dim < 4:
        raise ValueError("dim must be even and >= 4")
    B = time.shape[0]
    half = dim // 2

    # ---- lane packing / padding: every store is a full, unmasked 128-lane vst.
    if dim % _LANES == 0:
        k, width = 1, dim                         # already lane dense
    elif dim < _LANES and _LANES % dim == 0:
        k, width = _LANES // dim, _LANES          # pack k timesteps per output row
    else:
        k, width = 1, _round_up(dim, _LANES)      # zero-pad lanes, slice after
    kp = _round_up(k, _SUBLANES) if k > 1 else 1  # timestep columns fed to the kernel

    rows = pl.cdiv(B, k)
    rows_pad = _round_up(rows, _SUBLANES)
    b_pad = rows_pad * k
    t32 = jnp.pad(time.astype(jnp.float32), (0, b_pad - B))

    # ---- constant frequency / phase tables (built once, outside the grid) ----
    scale = math.log(10000.0) / (half - 1)
    freqs = jnp.exp(jnp.arange(half, dtype=jnp.float32) * -scale)        # (half,)
    freq_full = jnp.concatenate([freqs, freqs])                          # (dim,)
    phase_full = jnp.concatenate(
        [jnp.zeros((half,), jnp.float32),
         jnp.full((half,), math.pi / 2.0, jnp.float32)])                 # (dim,)
    freq_w = jnp.tile(freq_full, k)
    phase_w = jnp.tile(phase_full, k)
    lane_pad = width - freq_w.shape[0]
    if lane_pad:
        freq_w = jnp.pad(freq_w, (0, lane_pad))
        phase_w = jnp.pad(phase_w, (0, lane_pad))
    tab = jnp.stack([freq_w, phase_w])                                   # (2, width)

    # ---- row tile: as large as the VMEM budget allows; >=2 steps when big ----
    if vmem_budget_bytes is None:
        vmem_budget_bytes = _default_vmem_budget_bytes()
    out_bytes = jnp.dtype(out_dtype).itemsize
    bytes_per_row = 2 * (width * out_bytes + kp * 4)        # double-buffered out + t
    max_tb = max(_SUBLANES,
                 (vmem_budget_bytes // bytes_per_row) // _SUBLANES * _SUBLANES)
    tb = min(block_rows, rows_pad, max_tb)
    if rows_pad >= 256:   # keep >=2 grid steps so v7x can shard the parallel axis
        tb = min(tb, _round_up(pl.cdiv(rows_pad, 2), _SUBLANES))
    tb = max(_SUBLANES, (tb // _SUBLANES) * _SUBLANES)
    grid = (pl.cdiv(rows_pad, tb),)

    compiler_params = pltpu.CompilerParams(
        dimension_semantics=("parallel",),                  # dual-TC sharding on v7x
        vmem_limit_bytes=max(32 * 1024 * 1024, 2 * vmem_budget_bytes),
    )
    out_shape = jax.ShapeDtypeStruct((rows_pad, width), out_dtype)
    out_spec = pl.BlockSpec((tb, width), lambda i: (i, 0))
    tab_spec = pl.BlockSpec((2, width), lambda i: (0, 0))   # constant table

    if k > 1:
        # Packed path: tiny 0/1 block-one-hot matmul broadcasts each timestep
        # across its dim-wide lane group on the MXU.
        t_aug = jnp.pad(t32.reshape(rows_pad, k), ((0, 0), (0, kp - k)))  # (rows_pad, kp)
        w = jnp.concatenate(
            [jnp.kron(jnp.eye(k, dtype=jnp.float32),
                      jnp.ones((1, dim), jnp.float32)),                   # (k, width)
             jnp.zeros((kp - k, width), jnp.float32)], axis=0)            # (kp, width)
        out = pl.pallas_call(
            _packed_kernel,
            out_shape=out_shape,
            grid=grid,
            in_specs=[
                pl.BlockSpec((tb, kp), lambda i: (i, 0)),   # packed timesteps
                pl.BlockSpec((kp, width), lambda i: (0, 0)),  # constant one-hot W
                tab_spec,
            ],
            out_specs=out_spec,
            compiler_params=compiler_params,
        )(t_aug, w, tab)
        emb = out.reshape(rows_pad * k, dim)   # free: identical row-major bytes
    else:
        out = pl.pallas_call(
            _rowwise_kernel,
            out_shape=out_shape,
            grid=grid,
            in_specs=[
                pl.BlockSpec((tb, 1), lambda i: (i, 0)),    # timesteps
                tab_spec,
            ],
            out_specs=out_spec,
            compiler_params=compiler_params,
        )(t32.reshape(rows_pad, 1), tab)
        emb = out

    return emb[:B, :dim]


# ---------------------------------------------------------------------------
# Reference + self-test
# ---------------------------------------------------------------------------
def _reference(time, dim):
    half = dim // 2
    scale = math.log(10000.0) / (half - 1)
    freqs = jnp.exp(jnp.arange(half, dtype=jnp.float32) * -scale)
    ang = time.astype(jnp.float32)[:, None] * freqs[None, :]
    return jnp.concatenate([jnp.sin(ang), jnp.cos(ang)], axis=-1)


if __name__ == "__main__":
    key = jax.random.PRNGKey(0)

    # (B, dim): packed MXU path (dim=32 -> k=4), lane-dense k==1 path (dim=128),
    # and the padded fallback (dim=20 does not divide 128, B not a sublane multiple).
    cases = [(8, 32), (8, 128), (5, 20)]
    for i, (b, d) in enumerate(cases):
        t = jax.random.uniform(jax.random.fold_in(key, i), (b,),
                               dtype=jnp.float32, minval=0.0, maxval=1000.0)
        out = jax.block_until_ready(sinusoidal_position_embeddings(t, d))
        ref = _reference(t, d)
        assert out.shape == (b, d) and out.dtype == jnp.float32
        err = float(jnp.max(jnp.abs(out - ref)))
        # cos(x)=sin(x+pi/2) plus f32 angle math at |angle|~1e3 costs a few ulps
        # of 1e3 (~1e-4); anything larger indicates a precision/indexing bug
        # (a bf16 one-pass matmul would be O(1) wrong).
        assert err < 5e-4, (b, d, err)

    # Documented bf16 fast path (what a bf16 time-MLP would consume).
    t = jax.random.uniform(jax.random.fold_in(key, 100), (8,),
                           dtype=jnp.float32, minval=0.0, maxval=1000.0)
    out_bf16 = jax.block_until_ready(
        sinusoidal_position_embeddings(t, 32, out_dtype=jnp.bfloat16))
    assert out_bf16.shape == (8, 32) and out_bf16.dtype == jnp.bfloat16
    err = float(jnp.max(jnp.abs(out_bf16.astype(jnp.float32) - _reference(t, 32))))
    assert err < 1.5e-2, err

    print("KERNEL_OK")
</pallas_src>

<mosaic_0001>
module attributes {stable_mosaic.version = 11 : i64} {
  func.func @_packed_kernel(%arg0: i32, %arg1: memref<8x8xf32, #tpu.memory_space<vmem>>, %arg2: memref<8x128xf32, #tpu.memory_space<vmem>>, %arg3: memref<2x128xf32, #tpu.memory_space<vmem>>, %arg4: memref<8x128xf32, #tpu.memory_space<vmem>>) attributes {dimension_semantics = [#tpu.dimension_semantics<parallel>], iteration_bounds = array<i64: 1>, scalar_prefetch = 0 : i64, scratch_operands = 0 : i64, tpu.core_type = #tpu.core_type<tc>, window_params = [{transform_indices = @transform_0, window_bounds = array<i64: 8, 8>}, {pipeline_mode = #tpu.pipeline_mode<synchronous>, transform_indices = @transform_1, window_bounds = array<i64: 8, 128>}, {pipeline_mode = #tpu.pipeline_mode<synchronous>, transform_indices = @transform_2, window_bounds = array<i64: 2, 128>}, {transform_indices = @transform_3, window_bounds = array<i64: 8, 128>}]} {
    %c0 = arith.constant 0 : index
    %c0_0 = arith.constant 0 : index
    %0 = vector.load %arg1[%c0, %c0_0] : memref<8x8xf32, #tpu.memory_space<vmem>>, vector<8x8xf32>
    %c0_1 = arith.constant 0 : index
    %c0_2 = arith.constant 0 : index
    %1 = vector.load %arg2[%c0_1, %c0_2] : memref<8x128xf32, #tpu.memory_space<vmem>>, vector<8x128xf32>
    %cst = arith.constant dense<0.000000e+00> : vector<8x128xf32>
    %2 = tpu.matmul %0, %1, %cst {dimension_numbers = #tpu.dot_dimension_numbers<[1], [0], [0], [1], [0, 0, 1, 1], [], []>, precision = #tpu.contract_precision<fp32>} : vector<8x8xf32>, vector<8x128xf32>, vector<8x128xf32> -> vector<8x128xf32>
    %c0_3 = arith.constant 0 : index
    %c0_4 = arith.constant 0 : index
    %3 = vector.load %arg3[%c0_3, %c0_4] : memref<2x128xf32, #tpu.memory_space<vmem>>, vector<1x128xf32>
    %c1 = arith.constant 1 : index
    %c0_5 = arith.constant 0 : index
    %4 = vector.load %arg3[%c1, %c0_5] : memref<2x128xf32, #tpu.memory_space<vmem>>, vector<1x128xf32>
    %5 = vector.broadcast %3 : vector<1x128xf32> to vector<8x128xf32>
    %6 = arith.mulf %2, %5 : vector<8x128xf32>
    %7 = vector.broadcast %4 : vector<1x128xf32> to vector<8x128xf32>
    %8 = arith.addf %6, %7 : vector<8x128xf32>
    %9 = math.sin %8 : vector<8x128xf32>
    %c0_6 = arith.constant 0 : index
    %c0_7 = arith.constant 0 : index
    %10 = vector.load %arg4[%c0_6, %c0_7] : memref<8x128xf32, #tpu.memory_space<vmem>>, vector<8x128xf32>
    tpu.vector_store %arg4[%c0_6, %c0_7], %9 {strides = array<i32>} : memref<8x128xf32, #tpu.memory_space<vmem>>, vector<8x128xf32>,
    return
  }
  func.func @transform_0(%arg0: i32) -> (i32, i32) {
    %c0_i32 = arith.constant 0 : i32
    %c0_i32_0 = arith.constant 0 : i32
    return %arg0, %c0_i32 : i32, i32
  }
  func.func @transform_1(%arg0: i32) -> (i32, i32) {
    %c0_i32 = arith.constant 0 : i32
    %c0_i32_0 = arith.constant 0 : i32
    %c0_i32_1 = arith.constant 0 : i32
    return %c0_i32, %c0_i32_0 : i32, i32
  }
  func.func @transform_2(%arg0: i32) -> (i32, i32) {
    %c0_i32 = arith.constant 0 : i32
    %c0_i32_0 = arith.constant 0 : i32
    %c0_i32_1 = arith.constant 0 : i32
    return %c0_i32, %c0_i32_0 : i32, i32
  }
  func.func @transform_3(%arg0: i32) -> (i32, i32) {
    %c0_i32 = arith.constant 0 : i32
    %c0_i32_0 = arith.constant 0 : i32
    return %arg0, %c0_i32 : i32, i32
  }
}

</mosaic_0001>

<bundles_post_ra>
// kernel: tpu_custom_call.1
= control target key start
LH: loop header
LB: loop body
LE: loop exit
PB: predicated region body
PF: predicated region fallthrough
CT: control target
= control target key end

     0   :  { %8 = vsyncpa [#allocation3], 0  ;;  %s872_s0 = inlined_call_operand.hbm [shape: f32[8,8], index: 0, kind: input, shape index: {}]   ;;  %s873_s1 = inlined_call_operand.hbm [shape: f32[8,128], index: 1, kind: input, shape index: {}]   ;;  %s874_s2 = inlined_call_operand.vmem [shape: f32[2,128], index: 2, kind: input, shape index: {}]   ;;  %s875_s3 = inlined_call_operand.hbm [shape: f32[8,128], index: 3, kind: output, shape index: {}]  }
   0x1   :  { %9 = vsyncpa [#allocation6], 0 }
   0x2   :  { %10 = vsyncpa [#allocation4], 0  ;;  %s772_s12 = smov [#allocation2]   ;;  %s773_s14 = smov [#allocation5]  }
   0x3   :  { %s17_s13 = sshll.u32 %s772_s12, 4  ;;  %s27_s15 = sshll.u32 %s773_s14, 4  ;;  %s18_s13 = int_to_ptr.vmem [resolvable:$true] %s17_s13  ;;  %s28_s15 = int_to_ptr.vmem [resolvable:$true] %s27_s15 }
   0x4   :  { %s700_s18 = scalar_lea.hbm %s872_s0, 128 }
   0x5   :  { %p701_p0 = scmp.ne.s32.totalorder %s872_s0, %s700_s18  ;;  %p704_p1 = scmp.lt.u32.totalorder %s700_s18, %s872_s0 }
   0x7   :  { %p706_p2 = pnand %p704_p1, %p701_p0 }
   0x9   :  { %709 = shalt.err (!%p706_p2)
}
   0xa   :  { %s710_s23 = scalar_lea.vmem %s18_s13, 128  ;;  %p715_p4 = scmp.lt.s32.totalorder %s18_s13, %s18_s13 }
   0xb   :  { %p711_p3 = scmp.ne.s32.totalorder %s18_s13, %s710_s23  ;;  %p716_p5 = scmp.lt.s32.totalorder %s710_s23, %s710_s23 }
   0xd   :  { %p717_p6 = por %p716_p5, %p715_p4 }
   0xf   :  { %p718_p7 = pnand %p717_p6, %p711_p3 }
  0x11   :  { %721 = shalt.err (!%p718_p7)
}
  0x12   :  { %20 = dma.hbm_to_vmem [thread:$0]  %s872_s0, 128, %s18_s13, [#allocation3]  }
  0x13   :  { %s722_s28 = scalar_lea.hbm %s873_s1, 128 }
  0x14   :  { %p723_p8 = scmp.ne.s32.totalorder %s873_s1, %s722_s28  ;;  %p726_p9 = scmp.lt.u32.totalorder %s722_s28, %s873_s1 }
  0x16   :  { %p728_p10 = pnand %p726_p9, %p723_p8 }
  0x18   :  { %731 = shalt.err (!%p728_p10)
}
  0x19   :  { %s732_s6 = scalar_lea.vmem %s28_s15, 128  ;;  %p737_p12 = scmp.lt.s32.totalorder %s28_s15, %s28_s15 }
  0x1a   :  { %p733_p11 = scmp.ne.s32.totalorder %s28_s15, %s732_s6  ;;  %p738_p13 = scmp.lt.s32.totalorder %s732_s6, %s732_s6 }
  0x1c   :  { %p739_p0 = por %p738_p13, %p737_p12 }
  0x1e   :  { %p740_p1 = pnand %p739_p0, %p733_p11 }
  0x20   :  { %743 = shalt.err (!%p740_p1)
}
  0x21   :  { %30 = dma.hbm_to_vmem [thread:$0]  %s873_s1, 128, %s28_s15, [#allocation6]  }
  0x22   :  { %766 = dma.done.wait [#allocation3], 128  }
  0x23   :  { %767 = vsyncadd [#allocation3], 4294967168 }
  0x24   :  { %768 = dma.done.wait [#allocation6], 128  }
  0x25   :  { %769 = vsyncadd [#allocation6], 4294967168  ;;  %v774_v0 = vmov 0.0   ;;  %vm775_vm0 = vmmov 0   ;;  %vm41_vm1 = vcmask 64512   ;;  %v40_v1 = vld [vmem:[#allocation5] sm:$0xff] }
  0x26   :  { %657 = vmatprep.subr.mxu0 %v774_v0  ;;  %659 = vmatprep.mubr.msk.f32.mxu0 %vm775_vm0, %v774_v0  ;;  %v39_v2 = vld [vmem:[#allocation2] sm:$0xff]  ;;  %v46_v3 = vand.u32 4294901760, %v40_v1  ;;  %v776_v33 = vmov 683565275   ;;  %v777_v35 = vmov 2475754826  }
  0x27   :  { %642 = vmatprep.subr.mxu1 %v774_v0  ;;  %644 = vmatprep.mubr.msk.f32.mxu1 %vm775_vm0, %v774_v0  ;;  %v43_v4 = vsel %vm41_vm1, %v39_v2, 0  ;;  %v624_v17 = vld [vmem:[%s874_s2] ss:$0 sm:$0xff]  ;;  %v625_v20 = vld [vmem:[%s874_s2 + $0x1] ss:$0 sm:$0xff]  ;;  %s782_s2 = smov [#allocation7]  }
  0x28   :  { %v111_v5 = vand.u32 4294901760, %v43_v4  ;;  %v123_v6 = vsub.f32 %v40_v1, %v46_v3  ;;  %658 = vmatpush3.msra.mxu0 %v46_v3  ;;  %643 = vmatpush3.msra.mxu1 %v46_v3  ;;  %v778_v38 = vmov 2131351028   ;;  %v779_v41 = vmov 2102212464   ;;  %s614_s11 = sshll.u32 %s782_s2, 4  ;;  %s615_s11 = int_to_ptr.vmem [resolvable:$true] %s614_s11 }
  0x29   :  { %647 = vmatprep.subr.mxu1 %v774_v0  ;;  %662 = vmatprep.subr.mxu0 %v774_v0  ;;  %v780_v44 = vmov 920167782   ;;  %v781_v47 = vmov 1326507024   ;;  %s744_s12 = scalar_lea.vmem %s615_s11, 128  ;;  %p749_p3 = scmp.lt.s32.totalorder %s615_s11, %s615_s11 }
  0x2a   :  { %v112_v7 = vsub.f32 %v43_v4, %v111_v5  ;;  %v124_v8 = vand.u32 4294901760, %v123_v6  ;;  %p745_p2 = scmp.ne.s32.totalorder %s615_s11, %s744_s12  ;;  %p750_p4 = scmp.lt.s32.totalorder %s744_s12, %s744_s12 }
  0x2c   :  { %v113_v9 = vand.u32 4294901760, %v112_v7  ;;  %v125_v10 = vsub.f32 %v123_v6, %v124_v8  ;;  %p751_p5 = por %p750_p4, %p749_p3 }
  0x2e   :  { %660 = vmatmul.mubr.f32.vlgmr.msra.gmra.mrb[0].mxu0 %v113_v9  ;;  %v114_v11 = vsub.f32 %v112_v7, %v113_v9  ;;  %v126_v12 = vand.u32 4294901760, %v125_v10  ;;  %p752_p6 = pnand %p751_p5, %p745_p2 }
  0x2f   :  { %663 = vmatpush3.msra.mxu0 %v124_v8  ;;  %664 = vmatprep.mubr.msk.f32.mxu0 %vm775_vm0, %v774_v0 }
  0x30   :  { %v115_v13 = vand.u32 4294901760, %v114_v11  ;;  %667 = vmatprep.subr.mxu0 %v774_v0 }
  0x32   :  { %645 = vmatmul.mubr.f32.vlgmr.msra.gmra.mrb[0].mxu1 %v115_v13 }
  0x33   :  { %648 = vmatpush3.msra.mxu1 %v126_v12  ;;  %649 = vmatprep.mubr.msk.f32.mxu1 %vm775_vm0, %v774_v0 }
  0x34   :  { %652 = vmatprep.subr.mxu1 %v774_v0 }
  0x36   :  { %665 = vmatmul.mubr.f32.vlgmr.msra.gmra.mrb[0].mxu0 %v111_v5 }
  0x37   :  { %668 = vmatpush3.msra.mxu0 %v46_v3  ;;  %669 = vmatprep.mubr.msk.f32.mxu0 %vm775_vm0, %v774_v0 }
  0x3a   :  { %650 = vmatmul.mubr.f32.vlgmr.msra.gmra.mrb[0].mxu1 %v111_v5 }
  0x3b   :  { %653 = vmatpush3.msra.mxu1 %v123_v6  ;;  %654 = vmatprep.mubr.msk.f32.mxu1 %vm775_vm0, %v774_v0 }
  0x3e   :  { %670 = vmatmul.mubr.f32.vlgmr.msra.gmra.mrb[0].mxu0 %v111_v5 }
  0x42   :  { %655 = vmatmul.mubr.f32.vlgmr.msra.gmra.mrb[0].mxu1 %v112_v7 }
 0x111   :  { %v487_v14 = vpop.f32.mrb[0].mxu0 }
 0x112   :  { %v671_v15 = vpop.f32.mrb[1].mxu0 }
 0x115   :  { %v267_v16 = vpop.f32.mrb[0].mxu1 }
 0x116   :  { %v672_v18 = vadd.f32 %v487_v14, %v267_v16  ;;  %v656_v19 = vpop.f32.mrb[1].mxu1 }
 0x118   :  { %v497_v21 = vmul.f32 %v672_v18, %v624_v17 }
 0x11a   :  { %v839_v22 = vadd.f32 %v625_v20, %v497_v21 }
 0x11c   :  { %v506_v23 = vand.u32 2139095040, %v839_v22  ;;  %v503_v27 = vand.u32 2147483647, %v839_v22  ;;  %vm505_vm9 = vcmp.lt.s32.totalorder %v839_v22, 0  ;;  %vm595_vm14 = vweird.f32 %v839_v22 }
 0x11e   :  { %v507_v24 = vshrl.u32 %v506_v23, 23  ;;  %v510_v31 = vand.u32 8388607, %v503_v27  ;;  %vm504_vm10 = vcmp.le.f32.partialorder %v503_v27, 0.7853982 }
 0x120   :  { %v626_v25 = vadd.s32 4294967169, %v507_v24  ;;  %v511_v49 = vor.u32 8388608, %v510_v31 }
 0x122   :  { %v513_v26 = vadd.s32 1, %v626_v25  ;;  %v551_v63 = vshll.u32 %v511_v49, 8 }
 0x124   :  { %vm514_vm2 = vcmp.gt.s32.totalorder %v513_v26, 0 }
 0x125   :  { %v515_v28 = vsel %vm514_vm2, %v513_v26, 0 }
 0x126   :  { %v517_v29 = vand.u32 31, %v515_v28  ;;  %v516_v32 = vshrl.u32 %v515_v28, 5 }
 0x128   :  { %v518_v30 = vsub.s32 32, %v517_v29  ;;  %v520_v34 = vshll.u32 %v776_v33, %v517_v29  ;;  %v523_v36 = vshll.u32 %v777_v35, %v517_v29  ;;  %v526_v40 = vshll.u32 %v778_v38, %v517_v29 }
 0x129   :  { %v529_v43 = vshll.u32 %v779_v41, %v517_v29  ;;  %v532_v46 = vshll.u32 %v780_v44, %v517_v29  ;;  %vm535_vm3 = vcmp.lt.s32.totalorder %v516_v32, 1  ;;  %vm538_vm4 = vcmp.lt.s32.totalorder %v516_v32, 4 }
 0x12a   :  { %v521_v37 = vshrl.u32 %v777_v35, %v518_v30  ;;  %v524_v39 = vshrl.u32 %v778_v38, %v518_v30  ;;  %v527_v42 = vshrl.u32 %v779_v41, %v518_v30  ;;  %v530_v45 = vshrl.u32 %v780_v44, %v518_v30 }
 0x12b   :  { %v533_v48 = vshrl.u32 %v781_v47, %v518_v30  ;;  %v519_v58 = vshrl.u32 %v776_v33, %v518_v30  ;;  %vm537_vm5 = vcmp.lt.s32.totalorder %v516_v32, 3  ;;  %vm536_vm6 = vcmp.lt.s32.totalorder %v516_v32, 2 }
 0x12c   :  { %v522_v50 = vor.u32 %v521_v37, %v520_v34  ;;  %v525_v51 = vor.u32 %v524_v39, %v523_v36  ;;  %v528_v52 = vor.u32 %v527_v42, %v526_v40  ;;  %v531_v53 = vor.u32 %v530_v45, %v529_v43 }
 0x12d   :  { %v534_v54 = vor.u32 %v533_v48, %v532_v46 }
 0x12e   :  { %v540_v55 = vsel %vm538_vm4, %v528_v52, 2102212464  ;;  %v543_v56 = vsel %vm535_vm3, %v522_v50, %v525_v51  ;;  %v547_v57 = vsel %vm535_vm3, %v525_v51, %v528_v52  ;;  %v544_v59 = vsel %vm538_vm4, %v531_v53, 920167782 }
 0x12f   :  { %v548_v60 = vsel %vm538_vm4, %v534_v54, 1326507024  ;;  %v545_v61 = vsel %vm537_vm5, %v528_v52, %v544_v59  ;;  %v539_v0 = vsel %vm535_vm3, %v519_v58, %v522_v50  ;;  %v541_v1 = vsel %vm537_vm5, %v525_v51, %v540_v55 }
 0x130   :  { %v549_v62 = vsel %vm537_vm5, %v531_v53, %v548_v60  ;;  %v546_v2 = vsel %vm536_vm6, %v543_v56, %v545_v61  ;;  %v542_v8 = vsel %vm536_vm6, %v539_v0, %v541_v1 }
 0x131   :  { %v550_v3 = vsel %vm536_vm6, %v547_v57, %v549_v62  ;;  %v848_v6 = vmul.u32.u64.low %v551_v63, %v546_v2  ;;  %v849_v7 = vmul.u32.u64.high %v551_v63, %v546_v2, %v848_v6  ;;  %v558_v10 = vmul.u32 %v551_v63, %v542_v8 }
 0x132   :  { %v845_v4 = vmul.u32.u64.low %v551_v63, %v550_v3  ;;  %v846_v5 = vmul.u32.u64.high %v551_v63, %v550_v3, %v845_v4 }
 0x133   :  { %v561_v9 = vadd.s32 1, %v849_v7 }
 0x134   :  { %vm560_vm7 = vc.u32 %v846_v5, %v848_v6  ;;  %v559_v23 = vadd.s32 %v848_v6, %v846_v5 }
 0x135   :  { %v562_v11 = vsel %vm560_vm7, %v561_v9, %v849_v7 }
 0x136   :  { %v563_v12 = vadd.s32 %v562_v11, %v558_v10 }
 0x138   :  { %v564_v13 = vadd.s32 536870912, %v563_v12 }
 0x13a   :  { %v565_v14 = vshrl.u32 %v564_v13, 30 }
 0x13c   :  { %v566_v15 = vshll.u32 %v565_v14, 30  ;;  %v589_v36 = vsub.s32 4, %v565_v14 }
 0x13e   :  { %v567_v16 = vsub.s32 %v563_v12, %v566_v15  ;;  %v590_v39 = vsel %vm505_vm9, %v589_v36, %v565_v14 }
 0x13f   :  { %v592_v41 = vsel %vm504_vm10, 0, %v590_v39 }
 0x140   :  { %v569_v17 = vsub.s32 0, %v567_v16  ;;  %v596_v42 = vadd.s32 3, %v592_v41 }
 0x142   :  { %v627_v18 = vmin.u32 %v569_v17, %v567_v16  ;;  %v597_v43 = vand.u32 3, %v596_v42 }
 0x144   :  { %v571_v19 = vclz %v627_v18  ;;  %vm602_vm11 = vcmp.eq.s32.totalorder %v597_v43, 2  ;;  %vm599_vm12 = vcmp.eq.s32.totalorder %v597_v43, 0  ;;  %vm598_vm13 = vcmp.lt.s32.totalorder %v597_v43, 2 }
 0x146   :  { %v628_v20 = vadd.s32 4294967294, %v571_v19 }
 0x148   :  { %vm629_vm8 = vcmp.lt.s32.totalorder %v628_v20, 0 }
 0x149   :  { %v574_v21 = vsel %vm629_vm8, 0, %v628_v20 }
 0x14a   :  { %v575_v24 = vsub.s32 32, %v574_v21  ;;  %v579_v25 = vsub.s32 4294967266, %v574_v21  ;;  %v576_v26 = vshll.u32 %v567_v16, %v574_v21 }
 0x14c   :  { %v577_v28 = vshrl.u32 %v559_v23, %v575_v24  ;;  %v580_v29 = vadd.s32 127, %v579_v25 }
 0x14e   :  { %v578_v30 = vor.u32 %v577_v28, %v576_v26  ;;  %v581_v31 = vshll.u32 %v580_v29, 23 }
 0x150   :  { %v582_v32 = vor.u32 4788187, %v581_v31  ;;  %v585_v34 = vcvt.s32.f32 %v578_v30 }
 0x152   :  { %v583_v33 = vand.u32 2147483647, %v582_v32 }
 0x154   :  { %v586_v35 = vmul.f32 %v585_v34, %v583_v33 }
 0x156   :  { %v587_v37 = vxor.u32 2147483648, %v586_v35 }
 0x158   :  { %v588_v38 = vsel %vm505_vm9, %v587_v37, %v586_v35 }
 0x159   :  { %v591_v40 = vsel %vm504_vm10, %v839_v22, %v588_v38 }
 0x15a   :  { %696 = vcosq.f32 %v591_v40 }
 0x15b   :  { %698 = vsinq.f32 %v591_v40 }
 0x164   :  { %v697_v44 = vpop.eup %696 }
 0x165   :  { %v699_v45 = vpop.eup %698  ;;  %v603_v46 = vxor.u32 2147483648, %v697_v44 }
 0x166   :  { %v600_v47 = vxor.u32 2147483648, %v699_v45 }
 0x167   :  { %v604_v48 = vsel %vm602_vm11, %v603_v46, %v699_v45 }
 0x168   :  { %v601_v27 = vsel %vm599_vm12, %v697_v44, %v600_v47 }
 0x169   :  { %v605_v49 = vsel %vm598_vm13, %v601_v27, %v604_v48 }
 0x16a   :  { %v606_v50 = vsel %vm595_vm14, nan, %v605_v49 }
 0x16b   :  { %607 = vst [vmem:[#allocation7] sm:$0xff] %v606_v50 }
 0x16c   :  { %755 = shalt.err (!%p752_p6)
}
 0x16d   :  { %s756_s15 = scalar_lea.hbm %s875_s3, 128 }
 0x16e   :  { %p757_p7 = scmp.ne.s32.totalorder %s875_s3, %s756_s15  ;;  %p760_p8 = scmp.lt.u32.totalorder %s756_s15, %s875_s3 }
 0x170   :  { %p762_p9 = pnand %p760_p8, %p757_p7 }
 0x172   :  { %765 = shalt.err (!%p762_p9)
}
 0x173   :  { %617 = dma.vmem_to_hbm [thread:$0]  %s615_s11, 128, %s875_s3, [#allocation4]  }
 0x174   :  { %770 = dma.done.wait [#allocation4], 128  }
 0x175   :  { %771 = vsyncadd [#allocation4], 4294967168 }
 0x176   :  { %621 = vsyncpa [#allocation3], 1 }
 0x177   :  { %622 = vsyncpa [#allocation6], 1 }
 0x178   :  { %623 = vsyncpa [#allocation4], 1 }

</bundles_post_ra>
